<compile_context>
chip_gen: v6e
topology: v6e:2x2x1
jax: 0.10.0
libtpu: 0.0.40
codegen_flags: <defaults>
</compile_context>

<pallas_src>
import jax
import jax.numpy as jnp
from jax.experimental import pallas as pl
from jax.experimental.pallas import tpu as pltpu

LANES = 128  # vreg lane width


def not_op_kernel(wb_ref, x_ref, o_ref):
    # wb_ref: (2,) f32 in SMEM -> [weight, bias]; x_ref/o_ref: (tile_rows, 128) in VMEM
    w = wb_ref[0]
    b = wb_ref[1]
    z = x_ref[...] * w + b                    # Linear(1,1): x*w + b
    o_ref[...] = 1.0 / (1.0 + jnp.exp(-z))    # exact sigmoid (exp on EUP, exact divide)


def not_operator(x, weight, bias, *, tile_rows=1024):
    """Pallas equivalent of torch.sigmoid(nn.Linear(1,1)(x)) for x of shape (N, 1)."""
    # NOTE: for tiny N a plain-JAX sigmoid(x*w+b) is cheaper than any kernel launch;
    # the Pallas path below is the one that scales to large, HBM-bandwidth-bound N.
    x = jnp.asarray(x, jnp.float32)
    N = x.shape[0]

    # --- wrapper-side layout: lane-dense slab + row tiling --------------------------
    n_lane_pad = pl.cdiv(N, LANES) * LANES
    rows = n_lane_pad // LANES
    if rows <= tile_rows:
        tr = rows                         # single block == full array (always legal)
        rows_pad = rows
    else:
        tr = tile_rows                    # multiple of 8 -> (8,128)-aligned block
        rows_pad = pl.cdiv(rows, tr) * tr
    total = rows_pad * LANES

    x_slab = jnp.pad(x.reshape(-1), (0, total - N)).reshape(rows_pad, LANES)
    wb = jnp.concatenate(
        [weight.reshape(-1).astype(jnp.float32), bias.reshape(-1).astype(jnp.float32)]
    )

    out = pl.pallas_call(
        not_op_kernel,
        out_shape=jax.ShapeDtypeStruct((rows_pad, LANES), jnp.float32),
        grid_spec=pl.GridSpec(
            grid=(rows_pad // tr,),
            in_specs=[
                pl.BlockSpec(memory_space=pltpu.MemorySpace.SMEM),  # packed [w, b]
                pl.BlockSpec((tr, LANES), lambda i: (i, 0)),        # x tile
            ],
            out_specs=pl.BlockSpec((tr, LANES), lambda i: (i, 0)),
        ),
        compiler_params=pltpu.CompilerParams(
            dimension_semantics=("parallel",),  # megacore split on v7x, harmless on v5e/v6e
        ),
    )(wb, x_slab)

    # Drop the pad lanes (never read back into real rows) and restore (N, 1).
    return out.reshape(-1)[:N].reshape(N, 1)


if __name__ == "__main__":
    key = jax.random.PRNGKey(0)
    kx, kw, kb, kx2 = jax.random.split(key, 4)

    # Deterministic parameters mimicking nn.Linear(1, 1) default init
    # (uniform in [-1/sqrt(in_features), 1/sqrt(in_features)] = [-1, 1]).
    weight = jax.random.uniform(kw, (1, 1), dtype=jnp.float32, minval=-1.0, maxval=1.0)
    bias = jax.random.uniform(kb, (1,), dtype=jnp.float32, minval=-1.0, maxval=1.0)

    # Case 1: small batch (matches the module's (N, 1) input) -> single-block path.
    N1 = 8
    x1 = jax.random.normal(kx, (N1, 1), dtype=jnp.float32)
    out1 = not_operator(x1, weight, bias)
    jax.block_until_ready(out1)
    ref1 = jax.nn.sigmoid(x1 @ weight.T + bias)
    assert jnp.allclose(out1, ref1, atol=1e-5, rtol=1e-5), (out1, ref1)

    # Case 2: larger batch with a small tile to exercise the tiled grid path
    # (multi-block, parallel axis) while keeping shapes small.
    N2 = 4096
    x2 = jax.random.normal(kx2, (N2, 1), dtype=jnp.float32)
    out2 = not_operator(x2, weight, bias, tile_rows=8)
    jax.block_until_ready(out2)
    ref2 = jax.nn.sigmoid(x2 @ weight.T + bias)
    assert jnp.allclose(out2, ref2, atol=1e-5, rtol=1e-5), "large-batch mismatch"

    print("KERNEL_OK")
</pallas_src>

<mosaic_0001>
module attributes {stable_mosaic.version = 11 : i64} {
  func.func @not_op_kernel(%arg0: i32, %arg1: memref<2xf32, #tpu.memory_space<smem>>, %arg2: memref<1x128xf32, #tpu.memory_space<vmem>>, %arg3: memref<1x128xf32, #tpu.memory_space<vmem>>) attributes {dimension_semantics = [#tpu.dimension_semantics<parallel>], iteration_bounds = array<i64: 1>, scalar_prefetch = 0 : i64, scratch_operands = 0 : i64, tpu.core_type = #tpu.core_type<tc>, window_params = [{transform_indices = @transform_0, window_bounds = array<i64: 2>}, {transform_indices = @transform_1, window_bounds = array<i64: 1, 128>}, {transform_indices = @transform_2, window_bounds = array<i64: 1, 128>}]} {
    %c0 = arith.constant 0 : index
    %0 = memref.load %arg1[%c0] : memref<2xf32, #tpu.memory_space<smem>>
    %c1 = arith.constant 1 : index
    %1 = memref.load %arg1[%c1] : memref<2xf32, #tpu.memory_space<smem>>
    %c0_0 = arith.constant 0 : index
    %c0_1 = arith.constant 0 : index
    %2 = vector.load %arg2[%c0_0, %c0_1] : memref<1x128xf32, #tpu.memory_space<vmem>>, vector<1x128xf32>
    %3 = vector.broadcast %0 : f32 to vector<1x128xf32>
    %4 = arith.mulf %2, %3 : vector<1x128xf32>
    %5 = vector.broadcast %1 : f32 to vector<1x128xf32>
    %6 = arith.addf %4, %5 : vector<1x128xf32>
    %cst = arith.constant 0.000000e+00 : f32
    %7 = vector.broadcast %cst : f32 to vector<1x128xf32>
    %8 = arith.subf %7, %6 : vector<1x128xf32>
    %9 = math.exp %8 : vector<1x128xf32>
    %cst_2 = arith.constant 1.000000e+00 : f32
    %10 = vector.broadcast %cst_2 : f32 to vector<1x128xf32>
    %11 = arith.addf %10, %9 : vector<1x128xf32>
    %cst_3 = arith.constant 1.000000e+00 : f32
    %12 = vector.broadcast %cst_3 : f32 to vector<1x128xf32>
    %13 = arith.divf %12, %11 : vector<1x128xf32>
    %c0_4 = arith.constant 0 : index
    %c0_5 = arith.constant 0 : index
    %14 = vector.load %arg3[%c0_4, %c0_5] : memref<1x128xf32, #tpu.memory_space<vmem>>, vector<1x128xf32>
    tpu.vector_store %arg3[%c0_4, %c0_5], %13 {strides = array<i32>} : memref<1x128xf32, #tpu.memory_space<vmem>>, vector<1x128xf32>,
    return
  }
  func.func @transform_0(%arg0: i32) -> i32 {
    %c0_i32 = arith.constant 0 : i32
    %c0_i32_0 = arith.constant 0 : i32
    return %c0_i32 : i32
  }
  func.func @transform_1(%arg0: i32) -> (i32, i32) {
    %c0_i32 = arith.constant 0 : i32
    %c0_i32_0 = arith.constant 0 : i32
    return %arg0, %c0_i32 : i32, i32
  }
  func.func @transform_2(%arg0: i32) -> (i32, i32) {
    %c0_i32 = arith.constant 0 : i32
    %c0_i32_0 = arith.constant 0 : i32
    return %arg0, %c0_i32 : i32, i32
  }
}

</mosaic_0001>

<bundles_post_ra>
// kernel: tpu_custom_call.1
= control target key start
LH: loop header
LB: loop body
LE: loop exit
PB: predicated region body
PF: predicated region fallthrough
CT: control target
= control target key end

     0   :  { %7 = vsyncpa [#allocation4], 0  ;;  %s117_s0 = inlined_call_operand.hbm [shape: f32[2], index: 0, kind: input, shape index: {}]   ;;  %s118_s1 = inlined_call_operand.vmem [shape: f32[1,128], index: 1, kind: input, shape index: {}]   ;;  %s119_s2 = inlined_call_operand.hbm [shape: f32[1,128], index: 2, kind: output, shape index: {}]  }
   0x1   :  { %8 = vsyncpa [#allocation3], 0  ;;  %s91_s9 = smov [#allocation2]  }
   0x2   :  { %16 = dma.hbm_to_smem %s117_s0, 16, %s91_s9, [#allocation4]  }
   0x3   :  { %87 = dma.done.wait [#allocation4], 16  }
   0x4   :  { %88 = vsyncadd [#allocation4], 4294967280 }
   0x5   :  { %22 = sfence }
   0x6   :  { %s23_s12 = sld [smem:[#allocation2]]  ;;  %v25_v0 = vld [vmem:[%s118_s1] sm:$0x1]  ;;  %s92_s0 = smov [#allocation5]  }
   0x7   :  { %s52_s13 = sld [smem:[#allocation2 + $0x1]]  ;;  %s43_s16 = sshll.u32 %s92_s0, 4  ;;  %s44_s16 = int_to_ptr.vmem [resolvable:$true] %s43_s16 }
   0x8   :  { %s67_s17 = scalar_lea.vmem %s44_s16, 16  ;;  %s71_s18 = scalar_lea.vmem %s44_s16, 32 }
   0x9   :  { %p68_p0 = scmp.ne.s32.totalorder %s44_s16, %s67_s17  ;;  %p72_p1 = scmp.lt.s32.totalorder %s44_s16, %s44_s16 }
   0xa   :  { %p73_p2 = scmp.lt.s32.totalorder %s71_s18, %s67_s17 }
   0xc   :  { %v26_v1 = vstv %s23_s12  ;;  %p74_p3 = por %p73_p2, %p72_p1 }
   0xd   :  { %v27_v2 = vmul.f32 %v26_v1, %v25_v0  ;;  %v28_v3 = vstv %s52_s13 }
   0xe   :  { %p75_p4 = pnand %p74_p3, %p68_p0 }
   0xf   :  { %v29_v4 = vadd.f32 %v28_v3, %v27_v2 }
  0x11   :  { %v30_v5 = vsub.f32 0.0, %v29_v4 }
  0x13   :  { %v31_v6 = vmul.f32 1.442695, %v30_v5 }
  0x15   :  { %55 = vpow2.f32 %v31_v6 }
  0x22   :  { %v56_v7 = vpop.eup %55 }
  0x23   :  { %v33_v8 = vadd.f32 1.0, %v56_v7 }
  0x25   :  { %57 = vrcp.f32 %v33_v8 }
  0x32   :  { %v58_v9 = vpop.eup %57 }
  0x33   :  { %36 = vst [vmem:[#allocation5] sm:$0x1] %v58_v9 }
  0x34   :  { %78 = shalt.err (!%p75_p4)
}
  0x35   :  { %46 = dma.vmem_to_hbm [thread:$0]  %s44_s16, 16, %s119_s2, [#allocation3]  }
  0x36   :  { %89 = dma.done.wait [#allocation3], 16  }
  0x37   :  { %90 = vsyncadd [#allocation3], 4294967280 }
  0x38   :  { %50 = vsyncpa [#allocation3], 1 }
  0x39   :  { %51 = vsyncpa [#allocation4], 1 }

</bundles_post_ra>
